<compile_context>
chip_gen: v5e
topology: v5e:2x2
jax: 0.10.0
libtpu: 0.0.40
codegen_flags: <defaults>
</compile_context>

<pallas_src>
import jax
import jax.numpy as jnp
from jax.experimental import pallas as pl
from jax.experimental.pallas import tpu as pltpu


def _round_up(a, b):
    return ((a + b - 1) // b) * b


def bilstm_kernel(ids_ref,        # (L_pad,) int32, SMEM (scalar prefetch)
                  emb_hbm,        # (V, E) f32, HBM (pl.ANY) - never staged whole
                  w_gates_ref,    # (E, 3*Hp) f32, VMEM-resident [i | g | o]
                  w_tag_ref,      # (Hp, Tp) f32, VMEM-resident
                  bias_ref,       # (1, 3*Hp + Tp) f32, VMEM-resident
                  out_ref,        # (tile, Tp) f32, lane-dense
                  x_vmem,         # (tile, E) f32 scratch (gathered embeddings)
                  sem):           # DMA semaphore
    tile, _ = x_vmem.shape
    Hp = w_tag_ref.shape[0]
    GW = 3 * Hp
    base = pl.program_id(0) * tile

    # --- embedding gather: one row DMA per token (HBM -> VMEM scratch) ---
    def _issue(t, carry):
        tok = ids_ref[base + t]
        pltpu.make_async_copy(emb_hbm.at[pl.ds(tok, 1), :],
                              x_vmem.at[pl.ds(t, 1), :], sem).start()
        return carry
    jax.lax.fori_loop(0, tile, _issue, 0)

    def _wait(t, carry):
        # Every row copy signals the same sem with an identical byte count, so
        # waiting once per issued copy (with an equal-shaped descriptor) drains
        # it exactly before x_vmem is read.
        pltpu.make_async_copy(emb_hbm.at[pl.ds(0, 1), :],
                              x_vmem.at[pl.ds(0, 1), :], sem).wait()
        return carry
    jax.lax.fori_loop(0, tile, _wait, 0)

    x = x_vmem[...]                                                  # (tile, E)

    # --- fused i/g/o gates, both directions ([fwd | bwd | 0-pad] per gate) ---
    gates = jnp.dot(x, w_gates_ref[...], preferred_element_type=jnp.float32)
    gates = gates + bias_ref[:, :GW]                                 # (tile, 3*Hp)
    i = jax.nn.sigmoid(gates[:, :Hp])
    g = jnp.tanh(gates[:, Hp:2 * Hp])
    o = jax.nn.sigmoid(gates[:, 2 * Hp:])
    h = o * jnp.tanh(i * g)                    # c0 == 0: forget gate drops out
    lstm_out = jnp.tanh(h)                     # (tile, Hp) == [h_fwd | h_bwd | 0]

    # --- hidden2tag + log_softmax over (padded) tag lanes ---
    logits = jnp.dot(lstm_out, w_tag_ref[...], preferred_element_type=jnp.float32)
    logits = logits + bias_ref[:, GW:]         # padded tag columns carry -1e30
    s = logits - jnp.max(logits, axis=-1, keepdims=True)
    out_ref[...] = s - jnp.log(jnp.sum(jnp.exp(s), axis=-1, keepdims=True))


def bilstm_forward(sentence, emb_tbl, w_gates, w_tag, bias, tagset_size,
                   *, max_tile=512, target_blocks=2):
    """sentence: (L,) int ids; returns (L, tagset_size) f32 log-probabilities."""
    L = sentence.shape[0]
    V, E = emb_tbl.shape
    Hp, Tp = w_tag.shape
    GW = w_gates.shape[1]
    assert GW == 3 * Hp and bias.shape == (1, GW + Tp)

    # Whole sentence in one sublane-padded tile; long sentences split into >=2
    # "parallel" steps (feeds both v7x TensorCores) only when each block stays
    # large enough to amortize the ~0.35us per-step overhead (v5e/v6e: 1 TC,
    # extra steps are pure overhead, so short inputs stay single-step).
    L8 = _round_up(max(L, 8), 8)
    if target_blocks > 1 and L8 >= 64 * target_blocks:
        tile = _round_up(pl.cdiv(L8, target_blocks), 8)
    else:
        tile = L8
    tile = min(tile, max_tile)
    L_pad = _round_up(L8, tile)

    ids = jnp.zeros((L_pad,), jnp.int32).at[:L].set(sentence.astype(jnp.int32))

    const = lambda i, ids_ref: (0, 0)   # constant index_map -> block stays VMEM-resident
    out = pl.pallas_call(
        bilstm_kernel,
        out_shape=jax.ShapeDtypeStruct((L_pad, Tp), jnp.float32),
        grid_spec=pltpu.PrefetchScalarGridSpec(
            num_scalar_prefetch=1,
            grid=(L_pad // tile,),
            in_specs=[
                pl.BlockSpec(memory_space=pl.ANY),   # embedding table stays in HBM
                pl.BlockSpec((E, GW), const),        # fused gate weights [i|g|o]
                pl.BlockSpec((Hp, Tp), const),       # hidden2tag (lane-padded)
                pl.BlockSpec((1, GW + Tp), const),   # all biases fused into one block
            ],
            out_specs=pl.BlockSpec((tile, Tp), lambda i, ids_ref: (i, 0)),
            scratch_shapes=[
                pltpu.VMEM((tile, E), jnp.float32),
                pltpu.SemaphoreType.DMA(()),
            ],
        ),
        compiler_params=pltpu.CompilerParams(
            dimension_semantics=("parallel",)),
    )(ids, emb_tbl, w_gates, w_tag, bias)
    return out[:L, :tagset_size]


def reference_forward(sentence, word_embeddings,
                      w_ih_f, w_hh_f, b_ih_f, b_hh_f,
                      w_ih_b, w_hh_b, b_ih_b, b_hh_b,
                      lin_w, lin_b, hidden_dim):
    """Faithful per-token LSTM cell (length-1 sequences, zero initial state)."""
    H = hidden_dim
    x = jnp.take(word_embeddings, sentence, axis=0)                  # (L, E)
    L = x.shape[0]

    def direction(w_ih, w_hh, b_ih, b_hh):
        h0 = jnp.zeros((L, H), jnp.float32)
        c0 = jnp.zeros((L, H), jnp.float32)
        gates = x @ w_ih.T + h0 @ w_hh.T + b_ih + b_hh
        i, f, g, o = jnp.split(gates, 4, axis=1)
        c = jax.nn.sigmoid(f) * c0 + jax.nn.sigmoid(i) * jnp.tanh(g)
        return jax.nn.sigmoid(o) * jnp.tanh(c)

    h_f = direction(w_ih_f, w_hh_f, b_ih_f, b_hh_f)
    h_b = direction(w_ih_b, w_hh_b, b_ih_b, b_hh_b)
    lstm_out = jnp.tanh(jnp.concatenate([h_f, h_b], axis=1))
    tag = lstm_out @ lin_w.T + lin_b
    return jax.nn.log_softmax(tag, axis=1)


if __name__ == "__main__":
    vocab_size, embedding_dim, hidden_dim, tagset_size = 100, 32, 32, 16
    seq_len = 13                               # not a multiple of 8: exercises padding
    H = hidden_dim
    H2 = 2 * H
    Hp = _round_up(H2, 128)                    # gate block padded to a 128-lane boundary
    Tp = _round_up(tagset_size, 128)           # lane-dense output width

    key = jax.random.PRNGKey(0)
    ks = jax.random.split(key, 12)
    scale = 1.0 / float(hidden_dim) ** 0.5

    # Pretrained embedding table (synthetic, deterministic).
    word_embeddings = jax.random.normal(ks[0], (vocab_size, embedding_dim), jnp.float32)

    # nn.LSTM parameters, forward + reverse direction (PyTorch gate order i,f,g,o).
    w_ih_f = jax.random.uniform(ks[1], (4 * H, embedding_dim), jnp.float32, -scale, scale)
    w_hh_f = jax.random.uniform(ks[2], (4 * H, H), jnp.float32, -scale, scale)
    b_ih_f = jax.random.uniform(ks[3], (4 * H,), jnp.float32, -scale, scale)
    b_hh_f = jax.random.uniform(ks[4], (4 * H,), jnp.float32, -scale, scale)
    w_ih_b = jax.random.uniform(ks[5], (4 * H, embedding_dim), jnp.float32, -scale, scale)
    w_hh_b = jax.random.uniform(ks[6], (4 * H, H), jnp.float32, -scale, scale)
    b_ih_b = jax.random.uniform(ks[7], (4 * H,), jnp.float32, -scale, scale)
    b_hh_b = jax.random.uniform(ks[8], (4 * H,), jnp.float32, -scale, scale)

    # nn.Linear(hidden_dim * 2, tagset_size)
    lin_w = jax.random.uniform(ks[9], (tagset_size, 2 * H), jnp.float32, -scale, scale)
    lin_b = jax.random.uniform(ks[10], (tagset_size,), jnp.float32, -scale, scale)

    # --- fuse parameters for the kernel ---
    def gate(w, k):                 # (H, E) slice of gate k from a (4H, E) weight
        return w[k * H:(k + 1) * H]

    def gate_b(b_ih, b_hh, k):
        return (b_ih + b_hh)[k * H:(k + 1) * H]

    def fused_gate(k):              # (E, Hp) weight + (Hp,) bias, layout [fwd | bwd | 0-pad]
        w = jnp.zeros((embedding_dim, Hp), jnp.float32)
        w = w.at[:, :H].set(gate(w_ih_f, k).T).at[:, H:H2].set(gate(w_ih_b, k).T)
        b = jnp.zeros((Hp,), jnp.float32)
        b = b.at[:H].set(gate_b(b_ih_f, b_hh_f, k)).at[H:H2].set(gate_b(b_ih_b, b_hh_b, k))
        return w, b

    w_i, b_i = fused_gate(0)        # PyTorch gate order: i, f, g, o (f unused: c0 == 0)
    w_g, b_g = fused_gate(2)
    w_o, b_o = fused_gate(3)
    w_gates = jnp.concatenate([w_i, w_g, w_o], axis=1)               # (E, 3*Hp)

    # hidden2tag, padded: extra rows are zero, extra tag columns get -1e30 bias
    # so log_softmax over the padded 128 lanes equals log_softmax over the real T.
    w_tag = jnp.zeros((Hp, Tp), jnp.float32).at[:H2, :tagset_size].set(lin_w.T)
    b_tag = jnp.full((Tp,), -1e30, jnp.float32).at[:tagset_size].set(lin_b)
    bias = jnp.concatenate([b_i, b_g, b_o, b_tag])[None, :]          # (1, 3*Hp + Tp)

    sentence = jax.random.randint(ks[11], (seq_len,), 0, vocab_size, dtype=jnp.int32)

    out = bilstm_forward(sentence, word_embeddings, w_gates, w_tag, bias, tagset_size)
    out = jax.block_until_ready(out)

    ref = reference_forward(sentence, word_embeddings,
                            w_ih_f, w_hh_f, b_ih_f, b_hh_f,
                            w_ih_b, w_hh_b, b_ih_b, b_hh_b,
                            lin_w, lin_b, hidden_dim)
    assert out.shape == (seq_len, tagset_size)
    assert jnp.allclose(out, ref, atol=1e-5, rtol=1e-5)
    print("KERNEL_OK")
</pallas_src>

<mosaic_0001>
module attributes {stable_mosaic.version = 11 : i64} {
  func.func @bilstm_kernel(%arg0: i32, %arg1: memref<16xi32, #tpu.memory_space<smem>>, %arg2: memref<100x32xf32, #tpu.memory_space<any>>, %arg3: memref<32x384xf32, #tpu.memory_space<vmem>>, %arg4: memref<128x128xf32, #tpu.memory_space<vmem>>, %arg5: memref<1x512xf32, #tpu.memory_space<vmem>>, %arg6: memref<16x128xf32, #tpu.memory_space<vmem>>, %arg7: memref<16x32xf32, #tpu.memory_space<vmem>>, %arg8: memref<!tpu.dma_semaphore, #tpu.memory_space<semaphore_mem>>) attributes {dimension_semantics = [#tpu.dimension_semantics<parallel>], iteration_bounds = array<i64: 1>, scalar_prefetch = 1 : i64, scratch_operands = 2 : i64, tpu.core_type = #tpu.core_type<tc>, window_params = [{}, {pipeline_mode = #tpu.pipeline_mode<synchronous>, transform_indices = @transform_1, window_bounds = array<i64: 32, 384>}, {pipeline_mode = #tpu.pipeline_mode<synchronous>, transform_indices = @transform_2, window_bounds = array<i64: 128, 128>}, {pipeline_mode = #tpu.pipeline_mode<synchronous>, transform_indices = @transform_3, window_bounds = array<i64: 1, 512>}, {transform_indices = @transform_4, window_bounds = array<i64: 16, 128>}]} {
    %c16_i32 = arith.constant 16 : i32
    %0 = arith.muli %arg0, %c16_i32 : i32
    %c0_i32 = arith.constant 0 : i32
    %c16_i32_0 = arith.constant 16 : i32
    %1 = arith.addi %c0_i32, %c16_i32_0 : i32
    %c1_i32 = arith.constant 1 : i32
    scf.for %arg9 = %c0_i32 to %1 step %c1_i32  : i32 {
      %43 = arith.addi %0, %arg9 : i32
      %44 = arith.index_cast %43 : i32 to index
      %45 = memref.load %arg1[%44] : memref<16xi32, #tpu.memory_space<smem>>
      %c0_i32_20 = arith.constant 0 : i32
      %46 = tpu.memref_slice %arg2[%45, %c0_i32_20] : memref<100x32xf32, #tpu.memory_space<any>> -> memref<1x32xf32, #tpu.memory_space<any>>
      %c0_i32_21 = arith.constant 0 : i32
      %47 = tpu.memref_slice %arg7[%arg9, %c0_i32_21] : memref<16x32xf32, #tpu.memory_space<vmem>> -> memref<1x32xf32, #tpu.memory_space<vmem>>
      tpu.enqueue_dma source(%46 : memref<1x32xf32, #tpu.memory_space<any>>) target(%47 : memref<1x32xf32, #tpu.memory_space<vmem>>) target_semaphore(%arg8 : memref<!tpu.dma_semaphore, #tpu.memory_space<semaphore_mem>>)
    }
    %c16_i32_1 = arith.constant 16 : i32
    %c0_i32_2 = arith.constant 0 : i32
    %c16_i32_3 = arith.constant 16 : i32
    %2 = arith.addi %c0_i32_2, %c16_i32_3 : i32
    %c1_i32_4 = arith.constant 1 : i32
    scf.for %arg9 = %c0_i32_2 to %2 step %c1_i32_4  : i32 {
      %c0_i32_20 = arith.constant 0 : i32
      %c0_i32_21 = arith.constant 0 : i32
      %43 = tpu.memref_slice %arg2[%c0_i32_20, %c0_i32_21] : memref<100x32xf32, #tpu.memory_space<any>> -> memref<1x32xf32, #tpu.memory_space<any>>
      %c0_i32_22 = arith.constant 0 : i32
      %c0_i32_23 = arith.constant 0 : i32
      %44 = tpu.memref_slice %arg7[%c0_i32_22, %c0_i32_23] : memref<16x32xf32, #tpu.memory_space<vmem>> -> memref<1x32xf32, #tpu.memory_space<vmem>>
      tpu.wait_dma2 semaphore(%arg8 : memref<!tpu.dma_semaphore, #tpu.memory_space<semaphore_mem>>) src(%43 : memref<1x32xf32, #tpu.memory_space<any>>) dst(%44 : memref<1x32xf32, #tpu.memory_space<vmem>>)
    }
    %c0 = arith.constant 0 : index
    %c0_5 = arith.constant 0 : index
    %3 = vector.load %arg7[%c0, %c0_5] : memref<16x32xf32, #tpu.memory_space<vmem>>, vector<16x32xf32>
    %c0_6 = arith.constant 0 : index
    %c0_7 = arith.constant 0 : index
    %4 = vector.load %arg3[%c0_6, %c0_7] : memref<32x384xf32, #tpu.memory_space<vmem>>, vector<32x384xf32>
    %cst = arith.constant dense<0.000000e+00> : vector<16x384xf32>
    %5 = tpu.matmul %3, %4, %cst {dimension_numbers = #tpu.dot_dimension_numbers<[1], [0], [0], [1], [0, 0, 1, 1], [], []>} : vector<16x32xf32>, vector<32x384xf32>, vector<16x384xf32> -> vector<16x384xf32>
    %c0_8 = arith.constant 0 : index
    %c0_9 = arith.constant 0 : index
    %6 = vector.load %arg5[%c0_8, %c0_9] : memref<1x512xf32, #tpu.memory_space<vmem>>, vector<1x384xf32>
    %7 = vector.broadcast %6 : vector<1x384xf32> to vector<16x384xf32>
    %8 = arith.addf %5, %7 : vector<16x384xf32>
    %9 = vector.extract_strided_slice %8 {offsets = [0, 0], sizes = [16, 128], strides = [1, 1]} : vector<16x384xf32> to vector<16x128xf32>
    %10 = arith.negf %9 : vector<16x128xf32>
    %11 = math.exp %10 : vector<16x128xf32>
    %cst_10 = arith.constant 1.000000e+00 : f32
    %12 = vector.broadcast %cst_10 : f32 to vector<16x128xf32>
    %13 = arith.addf %12, %11 : vector<16x128xf32>
    %14 = arith.divf %12, %13 : vector<16x128xf32>
    %15 = vector.extract_strided_slice %8 {offsets = [0, 128], sizes = [16, 128], strides = [1, 1]} : vector<16x384xf32> to vector<16x128xf32>
    %16 = math.tanh %15 : vector<16x128xf32>
    %17 = vector.extract_strided_slice %8 {offsets = [0, 256], sizes = [16, 128], strides = [1, 1]} : vector<16x384xf32> to vector<16x128xf32>
    %18 = arith.negf %17 : vector<16x128xf32>
    %19 = math.exp %18 : vector<16x128xf32>
    %cst_11 = arith.constant 1.000000e+00 : f32
    %20 = vector.broadcast %cst_11 : f32 to vector<16x128xf32>
    %21 = arith.addf %20, %19 : vector<16x128xf32>
    %22 = arith.divf %20, %21 : vector<16x128xf32>
    %23 = arith.mulf %14, %16 : vector<16x128xf32>
    %24 = math.tanh %23 : vector<16x128xf32>
    %25 = arith.mulf %22, %24 : vector<16x128xf32>
    %26 = math.tanh %25 : vector<16x128xf32>
    %c0_12 = arith.constant 0 : index
    %c0_13 = arith.constant 0 : index
    %27 = vector.load %arg4[%c0_12, %c0_13] : memref<128x128xf32, #tpu.memory_space<vmem>>, vector<128x128xf32>
    %cst_14 = arith.constant dense<0.000000e+00> : vector<16x128xf32>
    %28 = tpu.matmul %26, %27, %cst_14 {dimension_numbers = #tpu.dot_dimension_numbers<[1], [0], [0], [1], [0, 0, 1, 1], [], []>} : vector<16x128xf32>, vector<128x128xf32>, vector<16x128xf32> -> vector<16x128xf32>
    %c0_15 = arith.constant 0 : index
    %c384 = arith.constant 384 : index
    %29 = vector.load %arg5[%c0_15, %c384] : memref<1x512xf32, #tpu.memory_space<vmem>>, vector<1x128xf32>
    %30 = vector.broadcast %29 : vector<1x128xf32> to vector<16x128xf32>
    %31 = arith.addf %28, %30 : vector<16x128xf32>
    %cst_16 = arith.constant dense<0xFF800000> : vector<16xf32>
    %32 = vector.multi_reduction <maximumf>, %31, %cst_16 [1] : vector<16x128xf32> to vector<16xf32>
    %33 = vector.shape_cast %32 : vector<16xf32> to vector<16x1xf32>
    %34 = vector.broadcast %33 : vector<16x1xf32> to vector<16x128xf32>
    %35 = arith.subf %31, %34 : vector<16x128xf32>
    %36 = math.exp %35 : vector<16x128xf32>
    %cst_17 = arith.constant dense<0.000000e+00> : vector<16xf32>
    %37 = vector.multi_reduction <add>, %36, %cst_17 [1] : vector<16x128xf32> to vector<16xf32>
    %38 = vector.shape_cast %37 : vector<16xf32> to vector<16x1xf32>
    %39 = math.log %38 : vector<16x1xf32>
    %40 = vector.broadcast %39 : vector<16x1xf32> to vector<16x128xf32>
    %41 = arith.subf %35, %40 : vector<16x128xf32>
    %c0_18 = arith.constant 0 : index
    %c0_19 = arith.constant 0 : index
    %42 = vector.load %arg6[%c0_18, %c0_19] : memref<16x128xf32, #tpu.memory_space<vmem>>, vector<16x128xf32>
    tpu.vector_store %arg6[%c0_18, %c0_19], %41 {strides = array<i32>} : memref<16x128xf32, #tpu.memory_space<vmem>>, vector<16x128xf32>,
    return
  }
  func.func @transform_1(%arg0: i32, %arg1: memref<16xi32, #tpu.memory_space<smem>>) -> (i32, i32) {
    %c0_i32 = arith.constant 0 : i32
    %c0_i32_0 = arith.constant 0 : i32
    %c0_i32_1 = arith.constant 0 : i32
    return %c0_i32, %c0_i32_0 : i32, i32
  }
  func.func @transform_2(%arg0: i32, %arg1: memref<16xi32, #tpu.memory_space<smem>>) -> (i32, i32) {
    %c0_i32 = arith.constant 0 : i32
    %c0_i32_0 = arith.constant 0 : i32
    %c0_i32_1 = arith.constant 0 : i32
    return %c0_i32, %c0_i32_0 : i32, i32
  }
  func.func @transform_3(%arg0: i32, %arg1: memref<16xi32, #tpu.memory_space<smem>>) -> (i32, i32) {
    %c0_i32 = arith.constant 0 : i32
    %c0_i32_0 = arith.constant 0 : i32
    %c0_i32_1 = arith.constant 0 : i32
    return %c0_i32, %c0_i32_0 : i32, i32
  }
  func.func @transform_4(%arg0: i32, %arg1: memref<16xi32, #tpu.memory_space<smem>>) -> (i32, i32) {
    %c0_i32 = arith.constant 0 : i32
    %c0_i32_0 = arith.constant 0 : i32
    return %arg0, %c0_i32 : i32, i32
  }
}

</mosaic_0001>

<bundles_post_ra>
// kernel: tpu_custom_call.1
= control target key start
LH: loop header
LB: loop body
LE: loop exit
PB: predicated region body
PF: predicated region fallthrough
CT: control target
= control target key end

     0   :  { %s540_s21 = smov [#allocation5]   ;;  %s648_s0 = inlined_call_operand.vmem [shape: s32[16], index: 0, kind: input, shape index: {}]   ;;  %s649_s1 = inlined_call_operand.vmem [shape: f32[100,32], index: 1, kind: input, shape index: {}]   ;;  %s650_s2 = inlined_call_operand.hbm [shape: f32[32,384], index: 2, kind: input, shape index: {}]   ;;  %s651_s3 = inlined_call_operand.vmem [shape: f32[128,128], index: 3, kind: input, shape index: {}]   ;;  %s652_s4 = inlined_call_operand.vmem [shape: f32[1,512], index: 4, kind: input, shape index: {}]   ;;  %s653_s5 = inlined_call_operand.hbm [shape: f32[16,128], index: 5, kind: output, shape index: {}]  }
   0x1   :  { %s11_s20 = sshll.u32 %s648_s0, 4  ;;  %s12_s20 = int_to_ptr.vmem [resolvable:$true] %s11_s20 }
   0x2   :  { %14 = dma.vmem_to_smem %s12_s20, 16, %s540_s21, [#allocation4] }
   0x3   :  { %524 = dma.done.wait [#allocation4], 16 }
   0x4   :  { %525 = vsyncadd [#allocation4], 4294967280 }
   0x5   :  { %17 = sfence }
   0x6   :  { %18 = vsyncpa [#allocation7], 0 }
   0x7   :  { %19 = vsyncpa [#allocation8], 0  ;;  %s24_s24 = sshll.u32 %s650_s2, 4  ;;  %s541_s25 = smov [#allocation6]   ;;  %s25_s24 = int_to_ptr.hbm [resolvable:$true] %s24_s24 }
   0x8   :  { %s26_s26 = sshll.u32 %s541_s25, 4  ;;  %s542_s27 = smov 384   ;;  %s27_s26 = int_to_ptr.vmem [resolvable:$true] %s26_s26 }
   0x9   :  { %s543_s28 = smov 24  }
   0xa   :  { %32 = dma.hbm_to_vmem [thread:$0]  %s25_s24, 1536, %s27_s26, [#allocation7], %s542_s27, %s542_s27, %s543_s28  }
   0xb   :  { %526 = dma.done.wait [#allocation7], 1536  }
   0xc   :  { %527 = vsyncadd [#allocation7], 4294965760  ;;  %s532_s0 = smov 0  }
   0xd LB: > { %s49_s29 = sld [smem:[#allocation5 + %s534_s0]]  ;;  %s51_s2 = scalar_lea.vmem [#allocation2], %s534_s0  ;;  %s534_s0 = sphi %s532_s0, %s47_s0  }
  0x13   : > { %s50_s7 = scalar_lea.vmem %s649_s1, %s49_s29 }
  0x14   : > { %v66_v0 = vld [vmem:[%s50_s7] sm:$0x1] }
  0x15   : > { %67 = vst [vmem:[%s51_s2] sm:$0x1] %v66_v0 }
  0x16   : > { %85 = vsyncadd [#allocation3], 16  ;;  %s47_s0 = sadd.s32 1, %s534_s0  }
  0x17   : > { %p44_p0 = scmp.ge.s32.totalorder %s47_s0, 16  }
  0x18   :  { %s536_s8 = smov (%p44_p0), 0  }
  0x19   :  { %46 = sbr.rel (!%p44_p0) target bundleno = 13 (0xd), region = 86 }
  0x1e LB: > { %528 = dma.done.wait [#allocation3], 16  ;;  %s538_s8 = sphi %s536_s8, %s91_s8  }
  0x1f   : > { %529 = vsyncadd [#allocation3], 4294967280  ;;  %s91_s8 = sadd.s32 1, %s538_s8  }
  0x20   : > { %p88_p1 = scmp.ge.s32.totalorder %s91_s8, 16  }
  0x21   :  { %v106_v1 = vld [vmem:[#allocation6 + $0x48] sm:$0xff] (%p88_p1)  ;;  %v108_v2 = vld [vmem:[#allocation6 + $0x58] sm:$0xff] (%p88_p1)  ;;  %v103_v3 = vld [vmem:[#allocation6 + $0x30] sm:$0xff] (%p88_p1)  ;;  %vm117_vm0 = vcmask (%p88_p1), 261120   ;;  %s350_s18 = sshll.u32 (%p88_p1), %s653_s5, 4  ;;  %s545_s19 = smov (%p88_p1), 128   ;;  %s351_s18 = int_to_ptr.hbm [resolvable:$true] %s350_s18 }
  0x22   :  { %90 = sbr.rel (!%p88_p1) target bundleno = 30 (0x1e), region = 97  ;;  %136 = vmatpush.msra.mxu0 (%p88_p1), %v106_v1  ;;  %182 = vmatpush.msra.mxu2 (%p88_p1), %v108_v2  ;;  %v105_v4 = vld [vmem:[#allocation6 + $0x40] sm:$0xff] (%p88_p1)  ;;  %v100_v5 = vld [vmem:[#allocation6 + $0x18] sm:$0xff] (%p88_p1)  ;;  %v102_v6 = vld [vmem:[#allocation6 + $0x28] sm:$0xff] (%p88_p1)  ;;  %s546_s20 = smov (%p88_p1), 8  }
  0x23   :  { %v107_v7 = vld [vmem:[#allocation6 + $0x50] sm:$0xff] (%p88_p1)  ;;  %v104_v8 = vld [vmem:[#allocation6 + $0x38] sm:$0xff] (%p88_p1)  ;;  %v97_v9 = vld [vmem:[#allocation6] sm:$0xff] (%p88_p1) }
  0x24   :  { %137 = vmatpush.msra.mxu0 (%p88_p1), %v103_v3  ;;  %183 = vmatpush.msra.mxu2 (%p88_p1), %v105_v4  ;;  %v99_v10 = vld [vmem:[#allocation6 + $0x10] sm:$0xff] (%p88_p1)  ;;  %v101_v12 = vld [vmem:[#allocation6 + $0x20] sm:$0xff] (%p88_p1)  ;;  %v98_v13 = vld [vmem:[#allocation6 + $0x8] sm:$0xff] (%p88_p1) }
  0x25   :  { %159 = vmatpush.msra.mxu1 (%p88_p1), %v107_v7  ;;  %v95_v11 = vld [vmem:[#allocation2] sm:$0xff] (%p88_p1)  ;;  %v96_v14 = vld [vmem:[#allocation2 + $0x8] sm:$0xff] (%p88_p1)  ;;  %v294_v15 = vld [vmem:[%s651_s3 + $0x78] sm:$0xff] (%p88_p1) }
  0x26   :  { %138 = vmatpush.msra.mxu0 (%p88_p1), %v100_v5  ;;  %184 = vmatpush.msra.mxu2 (%p88_p1), %v102_v6  ;;  %v293_v16 = vld [vmem:[%s651_s3 + $0x70] sm:$0xff] (%p88_p1)  ;;  %v292_v17 = vld [vmem:[%s651_s3 + $0x68] sm:$0xff] (%p88_p1)  ;;  %v291_v18 = vld [vmem:[%s651_s3 + $0x60] sm:$0xff] (%p88_p1) }
  0x27   :  { %160 = vmatpush.msra.mxu1 %v104_v8  ;;  %299 = vmatpush.msra.mxu3 %v294_v15  ;;  %v290_v19 = vld [vmem:[%s651_s3 + $0x58] sm:$0xff]  ;;  %v604_v20 = vld [vmem:[%s652_s4] sm:$0x7]  ;;  %v289_v21 = vld [vmem:[%s651_s3 + $0x50] sm:$0xff] }
  0x28   :  { %139 = vmatpush.msra.mxu0 %v97_v9  ;;  %185 = vmatpush.msra.mxu2 %v99_v10  ;;  %v111_v22 = vperm.slane %v604_v20, 0  ;;  %v288_v23 = vld [vmem:[%s651_s3 + $0x48] sm:$0xff]  ;;  %v287_v24 = vld [vmem:[%s651_s3 + $0x40] sm:$0xff]  ;;  %v286_v27 = vld [vmem:[%s651_s3 + $0x38] sm:$0xff]  ;;  %v113_v29 = vperm.slane %v604_v20, 2  ;;  %v112_v44 = vperm.slane %v604_v20, 1 }
  0x29   :  { %385 = vmatmul.msk.f32.vlgmr.msra.gmra.mxu0 %vm117_vm0, %v95_v11  ;;  %389 = vmatmul.msk.f32.vlgmr.msra.gmra.mxu2 %vm117_vm0, %v95_v11  ;;  %v285_v30 = vld [vmem:[%s651_s3 + $0x30] sm:$0xff]  ;;  %v284_v31 = vld [vmem:[%s651_s3 + $0x28] sm:$0xff]  ;;  %v283_v34 = vld [vmem:[%s651_s3 + $0x20] sm:$0xff] }
  0x2a   :  { %161 = vmatpush.msra.mxu1 %v101_v12  ;;  %300 = vmatpush.msra.mxu3 %v293_v16  ;;  %v282_v38 = vld [vmem:[%s651_s3 + $0x18] sm:$0xff]  ;;  %v281_v39 = vld [vmem:[%s651_s3 + $0x10] sm:$0xff]  ;;  %v280_v42 = vld [vmem:[%s651_s3 + $0x8] sm:$0xff] }
  0x2b   :  { %v279_v46 = vld [vmem:[%s651_s3] sm:$0xff] }
  0x2c   :  { %162 = vmatpush.msra.mxu1 %v98_v13  ;;  %301 = vmatpush.msra.mxu3 %v292_v17 }
  0x2d   :  { %387 = vmatmul.msk.f32.vlgmr.msra.gmra.mxu1 %vm117_vm0, %v95_v11 }
  0x2e   :  { %302 = vmatpush.msra.mxu3 %v291_v18 }
  0x30   :  { %303 = vmatpush.msra.mxu3 %v290_v19 }
  0x31   :  { %386 = vmatmul.msk.f32.gmra.mxu0 %vm117_vm0, %v96_v14  ;;  %390 = vmatmul.msk.f32.gmra.mxu2 %vm117_vm0, %v96_v14 }
  0x32   :  { %304 = vmatpush.msra.mxu3 %v289_v21 }
  0x34   :  { %305 = vmatpush.msra.mxu3 %v288_v23 }
  0x35   :  { %388 = vmatmul.msk.f32.gmra.mxu1 %vm117_vm0, %v96_v14 }
  0x36   :  { %306 = vmatpush.msra.mxu3 %v287_v24 }
  0x38   :  { %307 = vmatpush.msra.mxu3 %v286_v27 }
  0x3a   :  { %308 = vmatpush.msra.mxu3 %v285_v30 }
  0x3c   :  { %309 = vmatpush.msra.mxu3 %v284_v31 }
  0x3e   :  { %310 = vmatpush.msra.mxu3 %v283_v34 }
  0x40   :  { %311 = vmatpush.msra.mxu3 %v282_v38 }
  0x42   :  { %312 = vmatpush.msra.mxu3 %v281_v39 }
  0x44   :  { %313 = vmatpush.msra.mxu3 %v280_v42 }
  0x46   :  { %314 = vmatpush.msra.mxu3 %v279_v46 }
  0xa6   :  { %v141_v25 = vpop.f32.mrf.mxu0 }
  0xa7   :  { %v142_v26 = vadd.f32 %v141_v25, %v111_v22 }
  0xa9   :  { %v391_v28 = vmul.f32 -1.442695, %v142_v26 }
  0xaa   :  { %v164_v45 = vpop.f32.mrf.mxu1 }
  0xab   :  { %420 = vpow2.f32 %v391_v28  ;;  %v165_v51 = vadd.f32 %v164_v45, %v112_v44  ;;  %v419_v45 = vld [vmem:[%s652_s4 + $0x3] ss:$0 sm:$0xff]  ;;  %s544_s4 = smov [#allocation9]  }
  0xac   :  { %v187_v32 = vpop.f32.mrf.mxu2  ;;  %s348_s15 = sshll.u32 %s544_s4, 4  ;;  %s349_s15 = int_to_ptr.vmem [resolvable:$true] %s348_s15 }
  0xad   :  { %v188_v33 = vadd.f32 %v187_v32, %v113_v29 }
  0xae   :  { %v144_v35 = vpop.f32.mrf.mxu0 }
  0xaf   :  { %v393_v36 = vmul.f32 -1.442695, %v188_v33  ;;  %v145_v37 = vadd.f32 %v144_v35, %v111_v22 }
  0xb1   :  { %v421_v40 = vpop.eup %420  ;;  %422 = vpow2.f32 %v393_v36  ;;  %v392_v41 = vmul.f32 -1.442695, %v145_v37 }
  0xb2   :  { %v199_v43 = vadd.f32 1.0, %v421_v40  ;;  %v167_v58 = vpop.f32.mrf.mxu1 }
  0xb3   :  { %424 = vpow2.f32 %v392_v41  ;;  %v168_v1 = vadd.f32 %v167_v58, %v112_v44 }
  0xb4   :  { %426 = vrcp.f32 %v199_v43  ;;  %v190_v47 = vpop.f32.mrf.mxu2  ;;  %v212_v59 = vand.u32 2147483648, %v199_v43  ;;  %v210_v62 = vand.u32 2147483647, %v199_v43  ;;  %vm206_vm2 = vweird.f32 %v199_v43 }
  0xb5   :  { %v191_v48 = vadd.f32 %v190_v47, %v113_v29 }
  0xb6   :  { %v213_v6 = vor.u32 1.1754944e-38, %v212_v59  ;;  %vm211_vm4 = vcmp.eq.f32.partialorder %v210_v62, 8.507059e+37 }
  0xb7   :  { %v423_v49 = vpop.eup %422  ;;  %v394_v50 = vmul.f32 -1.442695, %v191_v48 }
  0xb8   :  { %v239_v52 = vadd.f32 1.0, %v423_v49 }
  0xb9   :  { %v425_v53 = vpop.eup %424  ;;  %428 = vpow2.f32 %v394_v50 }
  0xba   :  { %v427_v54 = vpop.eup %426  ;;  %430 = vrcp.f32 %v239_v52  ;;  %v200_v55 = vadd.f32 1.0, %v425_v53  ;;  %v252_v16 = vand.u32 2147483648, %v239_v52  ;;  %vm246_vm7 = vweird.f32 %v239_v52 }
  0xbb   :  { %v202_v56 = vmul.f32 %v427_v54, %v199_v43  ;;  %432 = vtanh.f32 %v165_v51  ;;  %vm207_vm1 = vweird.f32 %v427_v54  ;;  %v250_v20 = vand.u32 2147483647, %v239_v52 }
  0xbc   :  { %434 = vrcp.f32 %v200_v55  ;;  %vm208_vm3 = vmor %vm206_vm2, %vm207_vm1  ;;  %v225_v14 = vand.u32 2147483647, %v200_v55  ;;  %v227_v15 = vand.u32 2147483648, %v200_v55  ;;  %vm221_vm8 = vweird.f32 %v200_v55 }
  0xbd   :  { %v203_v57 = vsub.f32 1.0, %v202_v56  ;;  %v253_v28 = vor.u32 1.1754944e-38, %v252_v16  ;;  %vm251_vm12 = vcmp.eq.f32.partialorder %v250_v20, 8.507059e+37 }
  0xbe   :  { %v228_v24 = vor.u32 1.1754944e-38, %v227_v15  ;;  %vm226_vm11 = vcmp.eq.f32.partialorder %v225_v14, 8.507059e+37 }
  0xbf   :  { %v429_v60 = vpop.eup %428  ;;  %v204_v61 = vmul.f32 %v427_v54, %v203_v57 }
  0xc0   :  { %v431_v63 = vpop.eup %430  ;;  %v240_v0 = vadd.f32 1.0, %v429_v60 }
  0xc1   :  { %v433_v2 = vpop.eup %432  ;;  %v242_v3 = vmul.f32 %v431_v63, %v239_v52  ;;  %v205_v4 = vadd.f32 %v427_v54, %v204_v61  ;;  %vm247_vm5 = vweird.f32 %v431_v63 }
  0xc2   :  { %v435_v5 = vpop.eup %434  ;;  %436 = vrcp.f32 %v240_v0  ;;  %vm248_vm9 = vmor %vm246_vm7, %vm247_vm5  ;;  %v267_v36 = vand.u32 2147483648, %v240_v0  ;;  %vm261_vm14 = vweird.f32 %v240_v0  ;;  %v265_v37 = vand.u32 2147483647, %v240_v0 }
  0xc3   :  { %v243_v7 = vsub.f32 1.0, %v242_v3  ;;  %v217_v8 = vmul.f32 %v435_v5, %v200_v55  ;;  %v209_v9 = vsel %vm208_vm3, %v427_v54, %v205_v4  ;;  %438 = vtanh.f32 %v168_v1 }
  0xc4   :  { %v214_v10 = vsel %vm211_vm4, %v213_v6, %v209_v9  ;;  %vm222_vm6 = vweird.f32 %v435_v5  ;;  %v268_v39 = vor.u32 1.1754944e-38, %v267_v36  ;;  %vm266_vm0 = vcmp.eq.f32.partialorder %v265_v37, 8.507059e+37 }
  0xc5   :  { %v218_v11 = vsub.f32 1.0, %v217_v8  ;;  %v271_v12 = vmul.f32 %v433_v2, %v214_v10  ;;  %v244_v13 = vmul.f32 %v431_v63, %v243_v7  ;;  %vm223_vm10 = vmor %vm221_vm8, %vm222_vm6 }
  0xc7   :  { %440 = vtanh.f32 %v271_v12  ;;  %v219_v17 = vmul.f32 %v435_v5, %v218_v11  ;;  %v245_v18 = vadd.f32 %v431_v63, %v244_v13 }
  0xc8   :  { %v437_v19 = vpop.eup %436 }
  0xc9   :  { %v257_v21 = vmul.f32 %v437_v19, %v240_v0  ;;  %v220_v22 = vadd.f32 %v435_v5, %v219_v17  ;;  %v439_v23 = vpop.eup %438  ;;  %v249_v25 = vsel %vm248_vm9, %v431_v63, %v245_v18  ;;  %vm262_vm13 = vweird.f32 %v437_v19 }
  0xca   :  { %v254_v32 = vsel %vm251_vm12, %v253_v28, %v249_v25  ;;  %vm263_vm15 = vmor %vm261_vm14, %vm262_vm13 }
  0xcb   :  { %v258_v26 = vsub.f32 1.0, %v257_v21  ;;  %v224_v27 = vsel %vm223_vm10, %v435_v5, %v220_v22 }
  0xcc   :  { %v229_v29 = vsel %vm226_vm11, %v228_v24, %v224_v27 }
  0xcd   :  { %v441_v30 = vpop.eup %440  ;;  %v272_v31 = vmul.f32 %v439_v23, %v229_v29  ;;  %v259_v33 = vmul.f32 %v437_v19, %v258_v26 }
  0xce   :  { %v275_v34 = vmul.f32 %v441_v30, %v254_v32 }
  0xcf   :  { %442 = vtanh.f32 %v272_v31  ;;  %v260_v35 = vadd.f32 %v437_v19, %v259_v33 }
  0xd0   :  { %444 = vtanh.f32 %v275_v34 }
  0xd1   :  { %v264_v38 = vsel %vm263_vm15, %v437_v19, %v260_v35 }
  0xd2   :  { %v269_v41 = vsel %vm266_vm0, %v268_v39, %v264_v38 }
  0xd5   :  { %v443_v40 = vpop.eup %442 }
  0xd6   :  { %v445_v42 = vpop.eup %444  ;;  %v276_v43 = vmul.f32 %v443_v40, %v269_v41 }
  0xd7   :  { %315 = vmatmul.f32.vlgmr.msra.gmra.mxu3 %v445_v42 }
  0xd8   :  { %446 = vtanh.f32 %v276_v43 }
  0xde   :  { %v447_v44 = vpop.eup %446 }
  0xdf   :  { %318 = vmatmul.f32.gmra.mxu3 %v447_v44 }
 0x15a   :  { %v316_v46 = vpop.f32.mrf.mxu3 }
 0x15b   :  { %v317_v47 = vadd.f32 %v419_v45, %v316_v46 }
 0x15d   :  { %322 = vmax.xlane.f32.xlu0 %v317_v47 }
 0x162   :  { %v319_v48 = vpop.f32.mrf.mxu3 }
 0x163   :  { %v320_v49 = vadd.f32 %v419_v45, %v319_v48 }
 0x165   :  { %324 = vmax.xlane.f32.xlu0 %v320_v49 }
 0x1d0   :  { %v323_v50 = vpop.xlane.xlu0 %322 }
 0x1d1   :  { %v326_v51 = vsub.f32 %v317_v47, %v323_v50 }
 0x1d3   :  { %v328_v52 = vmul.f32 1.442695, %v326_v51 }
 0x1d5   :  { %448 = vpow2.f32 %v328_v52 }
 0x1d8   :  { %v325_v53 = vpop.xlane.xlu0 %324 }
 0x1d9   :  { %v327_v54 = vsub.f32 %v320_v49, %v325_v53 }
 0x1db   :  { %v449_v55 = vpop.eup %448  ;;  %v330_v56 = vmul.f32 1.442695, %v327_v54 }
 0x1dc   :  { %332 = vadd.xlane.f32.xlu1 %v449_v55 }
 0x1dd   :  { %450 = vpow2.f32 %v330_v56 }
 0x1e3   :  { %v451_v57 = vpop.eup %450 }
 0x1e4   :  { %334 = vadd.xlane.f32.xlu1 %v451_v57 }
 0x24f   :  { %v333_v58 = vpop.xlane.xlu1 %332 }
 0x250   :  { %452 = vlog2.f32 %v333_v58 }
 0x256   :  { %v453_v59 = vpop.eup %452 }
 0x257   :  { %v337_v60 = vmul.f32 0.6931472, %v453_v59  ;;  %v335_v61 = vpop.xlane.xlu1 %334 }
 0x258   :  { %454 = vlog2.f32 %v335_v61 }
 0x259   :  { %v340_v62 = vsub.f32 %v326_v51, %v337_v60 }
 0x25b   :  { %342 = vst [vmem:[#allocation9] sm:$0xff] %v340_v62 }
 0x25e   :  { %v455_v63 = vpop.eup %454 }
 0x25f   :  { %v339_v0 = vmul.f32 0.6931472, %v455_v63 }
 0x261   :  { %v341_v1 = vsub.f32 %v327_v54, %v339_v0 }
 0x263   :  { %343 = vst [vmem:[#allocation9 + $0x8] sm:$0xff] %v341_v1 }
 0x264   :  { %356 = dma.vmem_to_hbm [thread:$0]  %s349_s15, 256, %s351_s18, [#allocation8], %s545_s19, %s545_s19, %s546_s20  }
 0x265   :  { %530 = dma.done.wait [#allocation8], 256  }
 0x266   :  { %531 = vsyncadd [#allocation8], 4294967040 }
 0x267   :  { %361 = vsyncpa [#allocation7], 1 }
 0x268   :  { %362 = vsyncpa [#allocation8], 1 }
 0x269   :  { %363 = vsyncmov [#allocation3] }
 0x26c   :  { %s364_s21 = vpop.sfrf %363 }
 0x26d   :  { %p395_p2 = scmp.ne.s32.totalorder %s364_s21, 0 }
 0x26f   :  { %368 = shalt.err (%p395_p2)  }

</bundles_post_ra>
